<compile_context>
chip_gen: v7x
topology: tpu7x:2x2x1
jax: 0.10.0
libtpu: 0.0.40
codegen_flags: <defaults>
</compile_context>

<pallas_src>
import math

import jax
import jax.numpy as jnp
from jax.experimental import pallas as pl
from jax.experimental.pallas import tpu as pltpu

_MIB = 1024 * 1024


def _layerscale_kernel(x_ref, g_ref, o_ref):
    # x_ref: (TM, W) tile, g_ref: (1, W) gamma row -> lane-wise broadcast
    # multiply on the VPU; no in-kernel reshapes.
    o_ref[...] = x_ref[...] * g_ref[...]


def _sublane(itemsize: int) -> int:
    return {4: 8, 2: 16, 1: 32}.get(itemsize, 8)


def _vmem_budget_bytes() -> tuple[int, int]:
    """Returns (total budget for the 4 double-buffered x/o tiles, vmem_limit)."""
    try:
        cap = int(pltpu.get_tpu_info().vmem_capacity_bytes)
    except Exception:  # unknown chip / interpret mode: stay conservative
        cap = 64 * _MIB
    # v7x (64 MiB VMEM) -> 16 MiB of tiles; v5e/v6e (128 MiB) -> 24 MiB.
    budget = max(8 * _MIB, min(cap // 4, 24 * _MIB))
    vmem_limit = min(cap, 2 * budget)
    return budget, vmem_limit


def _row_tile(num_rows: int, width: int, itemsize: int, budget_bytes: int) -> int:
    """Pick the row tile TM.

    Sized from the VMEM budget (4 double-buffered x/o buffers), then capped so
    large tensors get >= 8 grid steps (software pipelining + v7x dual-TC
    sharding), preferring a TM that divides num_rows (no ragged last tile).
    """
    sublane = _sublane(itemsize)
    row_bytes = width * itemsize

    # Budget-limited tile (per buffer = budget / 4).
    tm = budget_bytes // (4 * row_bytes)
    tm = max(sublane, (tm // sublane) * sublane)

    # Never collapse a multi-MiB tensor into a 1-step grid: that disables the
    # pipeline (DMA-in / multiply / DMA-out run back-to-back) and leaves one
    # v7x TensorCore idle.
    _MIN_STEPS = 8
    _SPLIT_THRESHOLD = 2 * _MIB
    if num_rows * row_bytes >= _SPLIT_THRESHOLD:
        tm_split = pl.cdiv(num_rows, _MIN_STEPS)
        tm_split = max(sublane, pl.cdiv(tm_split, sublane) * sublane)
        tm = min(tm, tm_split)

    if tm >= num_rows:
        # Tiny tensor: a single full-extent block is cheapest.
        return num_rows

    # Prefer a nearby TM that divides num_rows: keeps every DMA and store
    # stream full-width instead of ending with a tiny masked tail tile.
    lo = max(sublane, tm - 16 * sublane)
    for cand in range(tm, lo - 1, -sublane):
        if num_rows % cand == 0:
            return cand
    return tm


def layer_scale(x: jax.Array, gamma: jax.Array, *, donate: bool = False) -> jax.Array:
    """Pallas TPU implementation of LayerScale.forward: y = x * gamma.

    x:     (..., C)
    gamma: (C,)
    donate=True aliases the input buffer to the output (mirrors
    LayerScale(inplace=True) - lets XLA drop the extra HBM output allocation
    when x is donated at the jit boundary).
    """
    orig_shape = x.shape
    C = orig_shape[-1]
    assert gamma.shape == (C,), "gamma must have shape (dim,)"
    # Keep the multiply in the activation dtype (see dtype note at top).
    gamma = gamma.astype(x.dtype)

    total = x.size
    itemsize = jnp.dtype(x.dtype).itemsize
    sublane = _sublane(itemsize)
    budget_bytes, vmem_limit = _vmem_budget_bytes()

    # Choose a lane-dense channel width W (multiple of 128 whenever possible).
    lcm = math.lcm(C, 128)
    if C % 128 == 0:
        W, g_row = C, gamma
    elif total % lcm == 0 and 4 * sublane * lcm * itemsize <= budget_bytes:
        # Repack awkward channel counts: (R, C) -> (R*C/W, W) with gamma tiled
        # W/C times; row-major reshape keeps the element/gamma pairing.
        W, g_row = lcm, jnp.tile(gamma, lcm // C)
    else:
        # Correctness fallback: last dim not 128-aligned -> masked lane stores.
        W, g_row = C, gamma

    R = total // W
    x2d = x.reshape(R, W)
    g2d = g_row.reshape(1, W)

    tm = _row_tile(R, W, itemsize, budget_bytes)
    grid = (pl.cdiv(R, tm),)

    out2d = pl.pallas_call(
        _layerscale_kernel,
        out_shape=jax.ShapeDtypeStruct((R, W), x.dtype),
        grid=grid,
        in_specs=[
            pl.BlockSpec((tm, W), lambda i: (i, 0)),
            pl.BlockSpec((1, W), lambda i: (0, 0)),
        ],
        out_specs=pl.BlockSpec((tm, W), lambda i: (i, 0)),
        compiler_params=pltpu.CompilerParams(
            dimension_semantics=("parallel",),
            vmem_limit_bytes=vmem_limit,
        ),
        input_output_aliases=({0: 0} if donate else {}),
    )(x2d, g2d)

    return out2d.reshape(orig_shape)


if __name__ == "__main__":
    key = jax.random.PRNGKey(0)
    init_values = 1e-5

    # Primary test, matching typical module usage: (B, N, C) activations.
    # C=32 exercises the lane-dense repack path (W = lcm(32, 128) = 128).
    B, N, C = 2, 8, 32
    x = jax.random.normal(key, (B, N, C), dtype=jnp.float32)
    gamma = init_values * jnp.ones((C,), dtype=jnp.float32)
    y = jax.block_until_ready(layer_scale(x, gamma))
    y_ref = x * gamma
    assert y.shape == x.shape and y.dtype == x.dtype
    assert jnp.allclose(y, y_ref, rtol=1e-6, atol=1e-6)

    # Lane-dense channel count (multiple of 128) + bf16 activations.
    x2 = jax.random.normal(jax.random.PRNGKey(1), (2, 16, 256), dtype=jnp.bfloat16)
    gamma2 = init_values * jnp.ones((256,), dtype=jnp.float32)
    y2 = jax.block_until_ready(layer_scale(x2, gamma2))
    y2_ref = x2 * gamma2.astype(jnp.bfloat16)
    assert y2.shape == x2.shape and y2.dtype == x2.dtype
    assert jnp.allclose(
        y2.astype(jnp.float32), y2_ref.astype(jnp.float32), rtol=1e-6, atol=1e-6
    )

    # lcm-repack path for an awkward channel count (C=96 -> W=384).
    x3 = jax.random.normal(jax.random.PRNGKey(2), (2, 8, 96), dtype=jnp.float32)
    gamma3 = init_values * jnp.ones((96,), dtype=jnp.float32)
    y3 = jax.block_until_ready(layer_scale(x3, gamma3))
    assert jnp.allclose(y3, x3 * gamma3, rtol=1e-6, atol=1e-6)

    # Fallback path: no lane-dense width exists (masked lane stores).
    x4 = jax.random.normal(jax.random.PRNGKey(3), (2, 3, 7), dtype=jnp.float32)
    gamma4 = init_values * jnp.ones((7,), dtype=jnp.float32)
    y4 = jax.block_until_ready(layer_scale(x4, gamma4))
    assert jnp.allclose(y4, x4 * gamma4, rtol=1e-6, atol=1e-6)

    print("KERNEL_OK")
</pallas_src>

<mosaic_0001>
module attributes {stable_mosaic.version = 11 : i64} {
  func.func @_layerscale_kernel(%arg0: i32, %arg1: memref<4x128xf32, #tpu.memory_space<vmem>>, %arg2: memref<1x128xf32, #tpu.memory_space<vmem>>, %arg3: memref<4x128xf32, #tpu.memory_space<vmem>>) attributes {dimension_semantics = [#tpu.dimension_semantics<parallel>], iteration_bounds = array<i64: 1>, scalar_prefetch = 0 : i64, scratch_operands = 0 : i64, tpu.core_type = #tpu.core_type<tc>, window_params = [{transform_indices = @transform_0, window_bounds = array<i64: 4, 128>}, {pipeline_mode = #tpu.pipeline_mode<synchronous>, transform_indices = @transform_1, window_bounds = array<i64: 1, 128>}, {transform_indices = @transform_2, window_bounds = array<i64: 4, 128>}]} {
    %c0 = arith.constant 0 : index
    %c0_0 = arith.constant 0 : index
    %0 = vector.load %arg1[%c0, %c0_0] : memref<4x128xf32, #tpu.memory_space<vmem>>, vector<4x128xf32>
    %c0_1 = arith.constant 0 : index
    %c0_2 = arith.constant 0 : index
    %1 = vector.load %arg2[%c0_1, %c0_2] : memref<1x128xf32, #tpu.memory_space<vmem>>, vector<1x128xf32>
    %2 = vector.broadcast %1 : vector<1x128xf32> to vector<4x128xf32>
    %3 = arith.mulf %0, %2 : vector<4x128xf32>
    %c0_3 = arith.constant 0 : index
    %c0_4 = arith.constant 0 : index
    %4 = vector.load %arg3[%c0_3, %c0_4] : memref<4x128xf32, #tpu.memory_space<vmem>>, vector<4x128xf32>
    tpu.vector_store %arg3[%c0_3, %c0_4], %3 {strides = array<i32>} : memref<4x128xf32, #tpu.memory_space<vmem>>, vector<4x128xf32>,
    return
  }
  func.func @transform_0(%arg0: i32) -> (i32, i32) {
    %c0_i32 = arith.constant 0 : i32
    %c0_i32_0 = arith.constant 0 : i32
    return %arg0, %c0_i32 : i32, i32
  }
  func.func @transform_1(%arg0: i32) -> (i32, i32) {
    %c0_i32 = arith.constant 0 : i32
    %c0_i32_0 = arith.constant 0 : i32
    %c0_i32_1 = arith.constant 0 : i32
    return %c0_i32, %c0_i32_0 : i32, i32
  }
  func.func @transform_2(%arg0: i32) -> (i32, i32) {
    %c0_i32 = arith.constant 0 : i32
    %c0_i32_0 = arith.constant 0 : i32
    return %arg0, %c0_i32 : i32, i32
  }
}

</mosaic_0001>

<bundles_post_ra>
// kernel: tpu_custom_call.1
= control target key start
LH: loop header
LB: loop body
LE: loop exit
PB: predicated region body
PF: predicated region fallthrough
CT: control target
= control target key end

     0   :  { %7 = vsyncpa [#allocation3], 0  ;;  %s144_s0 = inlined_call_operand.hbm [shape: f32[4,128], index: 0, kind: input, shape index: {}]   ;;  %s145_s1 = inlined_call_operand.vmem [shape: f32[1,128], index: 1, kind: input, shape index: {}]   ;;  %s146_s2 = inlined_call_operand.hbm [shape: f32[4,128], index: 2, kind: output, shape index: {}]  }
   0x1   :  { %8 = vsyncpa [#allocation4], 0  ;;  %s100_s9 = smov [#allocation2]   ;;  %s52_s13 = scalar_lea.hbm %s144_s0, 64 }
   0x2   :  { %s15_s10 = sshll.u32 %s100_s9, 4  ;;  %p53_p0 = scmp.ne.s32.totalorder %s144_s0, %s52_s13  ;;  %s16_s10 = int_to_ptr.vmem [resolvable:$true] %s15_s10 }
   0x3   :  { %p56_p1 = scmp.lt.u32.totalorder %s52_s13, %s144_s0 }
   0x5   :  { %p58_p2 = pnand %p56_p1, %p53_p0 }
   0x7   :  { %61 = shalt.err (!%p58_p2)
}
   0x8   :  { %s62_s18 = scalar_lea.vmem %s16_s10, 64  ;;  %p67_p4 = scmp.lt.s32.totalorder %s16_s10, %s16_s10 }
   0x9   :  { %p63_p3 = scmp.ne.s32.totalorder %s16_s10, %s62_s18  ;;  %p68_p5 = scmp.lt.s32.totalorder %s62_s18, %s62_s18 }
   0xb   :  { %p69_p6 = por %p68_p5, %p67_p4 }
   0xd   :  { %p70_p7 = pnand %p69_p6, %p63_p3 }
   0xf   :  { %73 = shalt.err (!%p70_p7)
}
  0x10   :  { %18 = dma.hbm_to_vmem [thread:$0]  %s144_s0, 64, %s16_s10, [#allocation3]  }
  0x11   :  { %96 = dma.done.wait [#allocation3], 64  }
  0x12   :  { %97 = vsyncadd [#allocation3], 4294967232  ;;  %s101_s21 = smov [#allocation5]   ;;  %v24_v0 = vld [vmem:[#allocation2] sm:$0xf] }
  0x13   :  { %s40_s22 = sshll.u32 %s101_s21, 4  ;;  %v49_v1 = vld [vmem:[%s145_s1] ss:$0 sm:$0xff]  ;;  %s41_s22 = int_to_ptr.vmem [resolvable:$true] %s40_s22 }
  0x14   :  { %v32_v2 = vmul.f32 %v49_v1, %v24_v0  ;;  %s74_s25 = scalar_lea.vmem %s41_s22, 64  ;;  %p79_p9 = scmp.lt.s32.totalorder %s41_s22, %s41_s22 }
  0x15   :  { %p75_p8 = scmp.ne.s32.totalorder %s41_s22, %s74_s25  ;;  %p80_p10 = scmp.lt.s32.totalorder %s74_s25, %s74_s25 }
  0x16   :  { %33 = vst [vmem:[#allocation5] sm:$0xf] %v32_v2 }
  0x17   :  { %p81_p11 = por %p80_p10, %p79_p9 }
  0x19   :  { %p82_p12 = pnand %p81_p11, %p75_p8 }
  0x1b   :  { %85 = shalt.err (!%p82_p12)
}
  0x1c   :  { %s86_s27 = scalar_lea.hbm %s146_s2, 64 }
  0x1d   :  { %p87_p13 = scmp.ne.s32.totalorder %s146_s2, %s86_s27  ;;  %p90_p0 = scmp.lt.u32.totalorder %s86_s27, %s146_s2 }
  0x1f   :  { %p92_p1 = pnand %p90_p0, %p87_p13 }
  0x21   :  { %95 = shalt.err (!%p92_p1)
}
  0x22   :  { %43 = dma.vmem_to_hbm [thread:$0]  %s41_s22, 64, %s146_s2, [#allocation4]  }
  0x23   :  { %98 = dma.done.wait [#allocation4], 64  }
  0x24   :  { %99 = vsyncadd [#allocation4], 4294967232 }
  0x25   :  { %47 = vsyncpa [#allocation3], 1 }
  0x26   :  { %48 = vsyncpa [#allocation4], 1 }

</bundles_post_ra>
